<compile_context>
chip_gen: v7x
topology: tpu7x:2x2x1
jax: 0.10.0
libtpu: 0.0.40
codegen_flags: <defaults>
</compile_context>

<pallas_src>
import functools
import math

import jax
import jax.numpy as jnp
from jax.experimental import pallas as pl
from jax.experimental.pallas import tpu as pltpu

LOG_SIG_MIN = -20.0
LOG_SIG_MAX = 2.0
TANH_EPS = 1e-6
LOG_SQRT_2PI = 0.5 * math.log(2.0 * math.pi)


def _round_up(x, m):
    return (x + m - 1) // m * m


def _cdiv(a, b):
    return (a + b - 1) // b


def _tanh_gaussian_policy_kernel(
    obs_ref,            # (obs_dim, tile_n)        f32
    noise_ref,          # (da_pad, tile_n)         f32
    w1_ref, b1_ref,     # (H, Do) bf16, (H, 1) f32
    w2_ref, b2_ref,     # (H, H)  bf16, (H, 1) f32
    wh_ref, bh_ref,     # (2*da_pad, H) bf16, (2*da_pad, 1) f32
    out_ref,            # (6*da_pad, tile_n)       f32 packed slab
    *, act_dim,
):
    dp = noise_ref.shape[0]          # padded action dim (multiple of 8)
    n = obs_ref.shape[1]             # tile_n (multiple of 128 -> lane dense)

    # batch-on-lanes: activations are (features, tile_n)
    x = obs_ref[...].astype(jnp.bfloat16)

    h1 = jnp.maximum(
        jnp.dot(w1_ref[...], x, preferred_element_type=jnp.float32)
        + b1_ref[...], 0.0)
    h2 = jnp.maximum(
        jnp.dot(w2_ref[...], h1.astype(jnp.bfloat16),
                preferred_element_type=jnp.float32) + b2_ref[...], 0.0)
    heads = jnp.dot(wh_ref[...], h2.astype(jnp.bfloat16),
                    preferred_element_type=jnp.float32) + bh_ref[...]

    mean = heads[:dp, :]                                   # sublane-aligned split
    log_std = jnp.clip(heads[dp:, :], LOG_SIG_MIN, LOG_SIG_MAX)
    std = jnp.exp(log_std)

    noise = noise_ref[...]
    pre_tanh = mean + std * noise
    action = jnp.tanh(pre_tanh)

    # Normal log-prob at pre_tanh: z == noise by construction (skip the divide),
    # plus the rlkit TanhNormal correction term.
    logp = (-0.5 * noise * noise - log_std - LOG_SQRT_2PI
            - jnp.log(1.0 - action * action + TANH_EPS))
    # padded action rows must not contribute to the sum
    row = jax.lax.broadcasted_iota(jnp.int32, logp.shape, 0)
    logp = jnp.where(row < act_dim, logp, 0.0)
    log_prob = jnp.sum(logp, axis=0, keepdims=True)        # (1, tile_n)

    # dense, sublane-aligned stores (no concat, no masked vst)
    out_ref[0 * dp:1 * dp, :] = action
    out_ref[1 * dp:2 * dp, :] = mean
    out_ref[2 * dp:3 * dp, :] = log_std
    out_ref[3 * dp:4 * dp, :] = std
    out_ref[4 * dp:5 * dp, :] = pre_tanh
    out_ref[5 * dp:6 * dp, :] = jnp.broadcast_to(log_prob, (dp, n))


class ExpAgentSimplePallas:
    """JAX/Pallas port of ExpAgentSimple: forward(obs) -> policy outputs."""

    def __init__(self, latent_dim, obs_dim, action_dim, hidden_dim, key):
        self.latent_dim = latent_dim
        self.obs_dim = obs_dim
        self.action_dim = action_dim
        self.hidden_dim = hidden_dim
        self.da_pad = _round_up(action_dim, 8)

        ks = jax.random.split(key, 8)

        def lin(kw, kb, fan_in, fan_out):
            bound = 1.0 / math.sqrt(fan_in)
            w = jax.random.uniform(kw, (fan_in, fan_out), jnp.float32, -bound, bound)
            b = jax.random.uniform(kb, (fan_out,), jnp.float32, -bound, bound)
            return w, b

        w1, b1 = lin(ks[0], ks[1], obs_dim, hidden_dim)
        w2, b2 = lin(ks[2], ks[3], hidden_dim, hidden_dim)
        wm, bm = lin(ks[4], ks[5], hidden_dim, action_dim)
        ws, bs = lin(ks[6], ks[7], hidden_dim, action_dim)

        dp = self.da_pad
        # batch-on-lanes layout: weights transposed, bf16; heads padded so the
        # mean / log_std split lands on an 8-sublane boundary.
        self.w1_t = w1.T.astype(jnp.bfloat16)                  # (H, Do)
        self.b1 = b1.reshape(hidden_dim, 1)                    # (H, 1) f32
        self.w2_t = w2.T.astype(jnp.bfloat16)                  # (H, H)
        self.b2 = b2.reshape(hidden_dim, 1)

        wh = jnp.zeros((2 * dp, hidden_dim), jnp.float32)
        wh = wh.at[0:action_dim, :].set(wm.T)                  # mean rows
        wh = wh.at[dp:dp + action_dim, :].set(ws.T)            # log_std rows
        self.wh_t = wh.astype(jnp.bfloat16)                    # (2*dp, H)
        bh = jnp.zeros((2 * dp, 1), jnp.float32)
        bh = bh.at[0:action_dim, 0].set(bm)
        bh = bh.at[dp:dp + action_dim, 0].set(bs)
        self.bh = bh

        # buffers z / z_means / z_vars (unused by forward, kept for parity)
        self.z = jnp.zeros((1, latent_dim), jnp.float32)
        self.z_means = jnp.zeros((1, latent_dim), jnp.float32)
        self.z_vars = jnp.zeros((1, latent_dim), jnp.float32)

    def forward(self, obs, noise_key, context=None):
        # obs: (t, b, obs_dim) float32
        t, b, d = obs.shape
        assert d == self.obs_dim
        da, dp, h = self.action_dim, self.da_pad, self.hidden_dim
        n = t * b

        # Batch rows go on the lane axis.  Cap tile at ~2048 rows and always use
        # an even number (>=2) of grid steps so v7x megacore can shard the
        # "parallel" axis; tiles are multiples of 256 lanes.
        TILE_CAP = 2048
        g = max(2, 2 * _cdiv(n, 2 * TILE_CAP))
        tile_n = _round_up(_cdiv(n, g), 256)
        n_pad = g * tile_n

        obs_t = obs.reshape(n, d).T                             # (Do, n)
        if n_pad != n:
            obs_t = jnp.pad(obs_t, ((0, 0), (0, n_pad - n)))

        # TODO(synk): draw noise in-kernel (pltpu.prng_seed / stateful_normal)
        # on real TPU to skip this HBM tensor; not done here because those
        # primitives do not lower in interpret mode.
        noise = jax.random.normal(noise_key, (dp, n_pad), jnp.float32)

        w_out = 6 * dp
        grid = (n_pad // tile_n,)

        grid_spec = pltpu.PrefetchScalarGridSpec(
            num_scalar_prefetch=0,
            grid=grid,
            in_specs=[
                pl.BlockSpec((d, tile_n), lambda i: (0, i)),        # obs tile
                pl.BlockSpec((dp, tile_n), lambda i: (0, i)),       # noise tile
                pl.BlockSpec((h, d), lambda i: (0, 0)),             # w1 (resident)
                pl.BlockSpec((h, 1), lambda i: (0, 0)),             # b1
                pl.BlockSpec((h, h), lambda i: (0, 0)),             # w2
                pl.BlockSpec((h, 1), lambda i: (0, 0)),             # b2
                pl.BlockSpec((2 * dp, h), lambda i: (0, 0)),        # fused heads W
                pl.BlockSpec((2 * dp, 1), lambda i: (0, 0)),        # fused heads b
            ],
            out_specs=pl.BlockSpec((w_out, tile_n), lambda i: (0, i)),
        )

        params_bytes = 2 * (d * h + h * h + h * 2 * dp) + 4 * (2 * h + 2 * dp)
        cost = pl.CostEstimate(
            flops=2 * n_pad * (d * h + h * h + h * 2 * dp),
            transcendentals=3 * n_pad * dp,
            bytes_accessed=4 * n_pad * (d + dp + w_out) + params_bytes,
        )

        out = pl.pallas_call(
            functools.partial(_tanh_gaussian_policy_kernel, act_dim=da),
            out_shape=jax.ShapeDtypeStruct((w_out, n_pad), jnp.float32),
            grid_spec=grid_spec,
            compiler_params=pltpu.CompilerParams(
                dimension_semantics=("parallel",),
            ),
            cost_estimate=cost,
        )(obs_t, noise, self.w1_t, self.b1, self.w2_t, self.b2,
          self.wh_t, self.bh)

        out = out[:, :n]                                         # (6*dp, n)

        def seg(k, width):
            return out[k * dp:k * dp + width, :].T.reshape(t, b, width)

        action = seg(0, da)
        mean = seg(1, da)
        log_std = seg(2, da)
        std = seg(3, da)
        pre_tanh = seg(4, da)
        log_prob = seg(5, 1)

        # Matches rlkit TanhGaussianPolicy output tuple:
        # (action, mean, log_std, log_prob, expected_log_prob, std,
        #  mean_action_log_prob, pre_tanh_value)
        # TODO(synk): expected_log_prob / mean_action_log_prob are None in the
        # reference forward path (only computed in other code paths).
        return (action, mean, log_std, log_prob, None, std, None, pre_tanh)

    __call__ = forward


if __name__ == "__main__":
    import numpy as np

    key = jax.random.PRNGKey(0)
    k_param, k_obs, k_noise = jax.random.split(key, 3)

    T, B, OBS_DIM, ACT_DIM, HIDDEN, LATENT = 8, 2, 16, 4, 32, 5

    agent = ExpAgentSimplePallas(
        latent_dim=LATENT, obs_dim=OBS_DIM, action_dim=ACT_DIM,
        hidden_dim=HIDDEN, key=k_param,
    )

    obs = jax.random.normal(k_obs, (T, B, OBS_DIM), jnp.float32)
    outs = agent(obs, k_noise)

    action, mean, log_std, log_prob, _, std, _, pre_tanh = outs
    jax.block_until_ready((action, mean, log_std, log_prob, std, pre_tanh))

    assert action.shape == (T, B, ACT_DIM)
    assert mean.shape == (T, B, ACT_DIM)
    assert log_std.shape == (T, B, ACT_DIM)
    assert std.shape == (T, B, ACT_DIM)
    assert pre_tanh.shape == (T, B, ACT_DIM)
    assert log_prob.shape == (T, B, 1)

    # Deterministic-part check against a pure-JAX reference with the same bf16
    # weight / bf16-activation casting (f32 accumulation).
    x = obs.reshape(T * B, OBS_DIM).astype(jnp.bfloat16)
    h1 = jax.nn.relu(jnp.dot(x, agent.w1_t.T,
                             preferred_element_type=jnp.float32) + agent.b1.T)
    h2 = jax.nn.relu(jnp.dot(h1.astype(jnp.bfloat16), agent.w2_t.T,
                             preferred_element_type=jnp.float32) + agent.b2.T)
    heads = jnp.dot(h2.astype(jnp.bfloat16), agent.wh_t.T,
                    preferred_element_type=jnp.float32) + agent.bh.T
    dp = agent.da_pad
    mean_ref = heads[:, 0:ACT_DIM].reshape(T, B, ACT_DIM)
    log_std_ref = jnp.clip(heads[:, dp:dp + ACT_DIM],
                           LOG_SIG_MIN, LOG_SIG_MAX).reshape(T, B, ACT_DIM)
    np.testing.assert_allclose(np.asarray(mean), np.asarray(mean_ref),
                               atol=1e-2, rtol=1e-2)
    np.testing.assert_allclose(np.asarray(log_std), np.asarray(log_std_ref),
                               atol=1e-2, rtol=1e-2)

    # Internal consistency of the sampled-path outputs.
    np.testing.assert_allclose(np.asarray(std), np.asarray(jnp.exp(log_std)),
                               atol=1e-5, rtol=1e-5)
    np.testing.assert_allclose(np.asarray(action), np.asarray(jnp.tanh(pre_tanh)),
                               atol=1e-5, rtol=1e-5)

    # log_prob consistency: recompute rlkit TanhNormal formula from kernel outputs.
    z = (pre_tanh - mean) / std
    logp_ref = jnp.sum(
        -0.5 * z * z - log_std - LOG_SQRT_2PI
        - jnp.log(1.0 - action * action + TANH_EPS),
        axis=-1, keepdims=True)
    np.testing.assert_allclose(np.asarray(log_prob), np.asarray(logp_ref),
                               atol=5e-3, rtol=5e-3)

    assert bool(jnp.all(jnp.isfinite(log_prob)))
    assert bool(jnp.all(jnp.abs(action) <= 1.0))

    print("KERNEL_OK")
</pallas_src>

<mosaic_0001>
module attributes {stable_mosaic.version = 11 : i64} {
  func.func @_tanh_gaussian_policy_kernel(%arg0: i32, %arg1: memref<16x256xf32, #tpu.memory_space<vmem>>, %arg2: memref<8x256xf32, #tpu.memory_space<vmem>>, %arg3: memref<32x16xbf16, #tpu.memory_space<vmem>>, %arg4: memref<32x1xf32, #tpu.memory_space<vmem>>, %arg5: memref<32x32xbf16, #tpu.memory_space<vmem>>, %arg6: memref<32x1xf32, #tpu.memory_space<vmem>>, %arg7: memref<16x32xbf16, #tpu.memory_space<vmem>>, %arg8: memref<16x1xf32, #tpu.memory_space<vmem>>, %arg9: memref<48x256xf32, #tpu.memory_space<vmem>>) attributes {dimension_semantics = [#tpu.dimension_semantics<parallel>], iteration_bounds = array<i64: 2>, scalar_prefetch = 0 : i64, scratch_operands = 0 : i64, tpu.core_type = #tpu.core_type<tc>, window_params = [{transform_indices = @transform_0, window_bounds = array<i64: 16, 256>}, {transform_indices = @transform_1, window_bounds = array<i64: 8, 256>}, {pipeline_mode = #tpu.pipeline_mode<synchronous>, transform_indices = @transform_2, window_bounds = array<i64: 32, 16>}, {pipeline_mode = #tpu.pipeline_mode<synchronous>, transform_indices = @transform_3, window_bounds = array<i64: 32, 1>}, {pipeline_mode = #tpu.pipeline_mode<synchronous>, transform_indices = @transform_4, window_bounds = array<i64: 32, 32>}, {pipeline_mode = #tpu.pipeline_mode<synchronous>, transform_indices = @transform_5, window_bounds = array<i64: 32, 1>}, {pipeline_mode = #tpu.pipeline_mode<synchronous>, transform_indices = @transform_6, window_bounds = array<i64: 16, 32>}, {pipeline_mode = #tpu.pipeline_mode<synchronous>, transform_indices = @transform_7, window_bounds = array<i64: 16, 1>}, {transform_indices = @transform_8, window_bounds = array<i64: 48, 256>}]} {
    %c0 = arith.constant 0 : index
    %c0_0 = arith.constant 0 : index
    %0 = vector.load %arg1[%c0, %c0_0] : memref<16x256xf32, #tpu.memory_space<vmem>>, vector<16x256xf32>
    %1 = arith.truncf %0 : vector<16x256xf32> to vector<16x256xbf16>
    %c0_1 = arith.constant 0 : index
    %c0_2 = arith.constant 0 : index
    %2 = vector.load %arg3[%c0_1, %c0_2] : memref<32x16xbf16, #tpu.memory_space<vmem>>, vector<32x16xbf16>
    %cst = arith.constant dense<0.000000e+00> : vector<32x256xf32>
    %3 = tpu.matmul %2, %1, %cst {dimension_numbers = #tpu.dot_dimension_numbers<[1], [0], [0], [1], [0, 0, 1, 1], [], []>} : vector<32x16xbf16>, vector<16x256xbf16>, vector<32x256xf32> -> vector<32x256xf32>
    %c0_3 = arith.constant 0 : index
    %c0_4 = arith.constant 0 : index
    %4 = vector.load %arg4[%c0_3, %c0_4] : memref<32x1xf32, #tpu.memory_space<vmem>>, vector<32x1xf32>
    %5 = vector.broadcast %4 : vector<32x1xf32> to vector<32x256xf32>
    %6 = arith.addf %3, %5 : vector<32x256xf32>
    %cst_5 = arith.constant 0.000000e+00 : f32
    %7 = vector.broadcast %cst_5 : f32 to vector<32x256xf32>
    %8 = arith.maximumf %6, %7 : vector<32x256xf32>
    %c0_6 = arith.constant 0 : index
    %c0_7 = arith.constant 0 : index
    %9 = vector.load %arg5[%c0_6, %c0_7] : memref<32x32xbf16, #tpu.memory_space<vmem>>, vector<32x32xbf16>
    %10 = arith.truncf %8 : vector<32x256xf32> to vector<32x256xbf16>
    %cst_8 = arith.constant dense<0.000000e+00> : vector<32x256xf32>
    %11 = tpu.matmul %9, %10, %cst_8 {dimension_numbers = #tpu.dot_dimension_numbers<[1], [0], [0], [1], [0, 0, 1, 1], [], []>} : vector<32x32xbf16>, vector<32x256xbf16>, vector<32x256xf32> -> vector<32x256xf32>
    %c0_9 = arith.constant 0 : index
    %c0_10 = arith.constant 0 : index
    %12 = vector.load %arg6[%c0_9, %c0_10] : memref<32x1xf32, #tpu.memory_space<vmem>>, vector<32x1xf32>
    %13 = vector.broadcast %12 : vector<32x1xf32> to vector<32x256xf32>
    %14 = arith.addf %11, %13 : vector<32x256xf32>
    %cst_11 = arith.constant 0.000000e+00 : f32
    %15 = vector.broadcast %cst_11 : f32 to vector<32x256xf32>
    %16 = arith.maximumf %14, %15 : vector<32x256xf32>
    %c0_12 = arith.constant 0 : index
    %c0_13 = arith.constant 0 : index
    %17 = vector.load %arg7[%c0_12, %c0_13] : memref<16x32xbf16, #tpu.memory_space<vmem>>, vector<16x32xbf16>
    %18 = arith.truncf %16 : vector<32x256xf32> to vector<32x256xbf16>
    %cst_14 = arith.constant dense<0.000000e+00> : vector<16x256xf32>
    %19 = tpu.matmul %17, %18, %cst_14 {dimension_numbers = #tpu.dot_dimension_numbers<[1], [0], [0], [1], [0, 0, 1, 1], [], []>} : vector<16x32xbf16>, vector<32x256xbf16>, vector<16x256xf32> -> vector<16x256xf32>
    %c0_15 = arith.constant 0 : index
    %c0_16 = arith.constant 0 : index
    %20 = vector.load %arg8[%c0_15, %c0_16] : memref<16x1xf32, #tpu.memory_space<vmem>>, vector<16x1xf32>
    %21 = vector.broadcast %20 : vector<16x1xf32> to vector<16x256xf32>
    %22 = arith.addf %19, %21 : vector<16x256xf32>
    %23 = vector.extract_strided_slice %22 {offsets = [0, 0], sizes = [8, 256], strides = [1, 1]} : vector<16x256xf32> to vector<8x256xf32>
    %24 = vector.extract_strided_slice %22 {offsets = [8, 0], sizes = [8, 256], strides = [1, 1]} : vector<16x256xf32> to vector<8x256xf32>
    %cst_17 = arith.constant -2.000000e+01 : f32
    %cst_18 = arith.constant 2.000000e+00 : f32
    %25 = vector.broadcast %cst_17 : f32 to vector<8x256xf32>
    %26 = arith.maximumf %25, %24 : vector<8x256xf32>
    %27 = vector.broadcast %cst_18 : f32 to vector<8x256xf32>
    %28 = arith.minimumf %27, %26 : vector<8x256xf32>
    %29 = math.exp %28 : vector<8x256xf32>
    %c0_19 = arith.constant 0 : index
    %c0_20 = arith.constant 0 : index
    %30 = vector.load %arg2[%c0_19, %c0_20] : memref<8x256xf32, #tpu.memory_space<vmem>>, vector<8x256xf32>
    %31 = arith.mulf %29, %30 : vector<8x256xf32>
    %32 = arith.addf %23, %31 : vector<8x256xf32>
    %33 = math.tanh %32 : vector<8x256xf32>
    %cst_21 = arith.constant -5.000000e-01 : f32
    %34 = vector.broadcast %cst_21 : f32 to vector<8x256xf32>
    %35 = arith.mulf %34, %30 : vector<8x256xf32>
    %36 = arith.mulf %35, %30 : vector<8x256xf32>
    %37 = arith.subf %36, %28 : vector<8x256xf32>
    %cst_22 = arith.constant 0.918938517 : f32
    %38 = vector.broadcast %cst_22 : f32 to vector<8x256xf32>
    %39 = arith.subf %37, %38 : vector<8x256xf32>
    %40 = arith.mulf %33, %33 : vector<8x256xf32>
    %cst_23 = arith.constant 1.000000e+00 : f32
    %41 = vector.broadcast %cst_23 : f32 to vector<8x256xf32>
    %42 = arith.subf %41, %40 : vector<8x256xf32>
    %cst_24 = arith.constant 9.99999997E-7 : f32
    %43 = vector.broadcast %cst_24 : f32 to vector<8x256xf32>
    %44 = arith.addf %42, %43 : vector<8x256xf32>
    %45 = math.log %44 : vector<8x256xf32>
    %46 = arith.subf %39, %45 : vector<8x256xf32>
    %47 = tpu.iota {dimensions = array<i32: 0>} : vector<8x256xi32>
    %c4_i32 = arith.constant 4 : i32
    %48 = vector.broadcast %c4_i32 : i32 to vector<8x256xi32>
    %49 = arith.cmpi slt, %47, %48 : vector<8x256xi32>
    %cst_25 = arith.constant 0.000000e+00 : f32
    %50 = vector.broadcast %cst_25 : f32 to vector<8x256xf32>
    %51 = arith.select %49, %46, %50 : vector<8x256xi1>, vector<8x256xf32>
    %cst_26 = arith.constant dense<0.000000e+00> : vector<256xf32>
    %52 = vector.multi_reduction <add>, %51, %cst_26 [0] : vector<8x256xf32> to vector<256xf32>
    %53 = vector.shape_cast %52 : vector<256xf32> to vector<1x256xf32>
    %c0_27 = arith.constant 0 : index
    %c0_28 = arith.constant 0 : index
    %54 = vector.load %arg9[%c0_27, %c0_28] : memref<48x256xf32, #tpu.memory_space<vmem>>, vector<8x256xf32>
    tpu.vector_store %arg9[%c0_27, %c0_28], %33 {strides = array<i32>} : memref<48x256xf32, #tpu.memory_space<vmem>>, vector<8x256xf32>,
    %c8 = arith.constant 8 : index
    %c0_29 = arith.constant 0 : index
    %55 = vector.load %arg9[%c8, %c0_29] : memref<48x256xf32, #tpu.memory_space<vmem>>, vector<8x256xf32>
    tpu.vector_store %arg9[%c8, %c0_29], %23 {strides = array<i32>} : memref<48x256xf32, #tpu.memory_space<vmem>>, vector<8x256xf32>,
    %c16 = arith.constant 16 : index
    %c0_30 = arith.constant 0 : index
    %56 = vector.load %arg9[%c16, %c0_30] : memref<48x256xf32, #tpu.memory_space<vmem>>, vector<8x256xf32>
    tpu.vector_store %arg9[%c16, %c0_30], %28 {strides = array<i32>} : memref<48x256xf32, #tpu.memory_space<vmem>>, vector<8x256xf32>,
    %c24 = arith.constant 24 : index
    %c0_31 = arith.constant 0 : index
    %57 = vector.load %arg9[%c24, %c0_31] : memref<48x256xf32, #tpu.memory_space<vmem>>, vector<8x256xf32>
    tpu.vector_store %arg9[%c24, %c0_31], %29 {strides = array<i32>} : memref<48x256xf32, #tpu.memory_space<vmem>>, vector<8x256xf32>,
    %c32 = arith.constant 32 : index
    %c0_32 = arith.constant 0 : index
    %58 = vector.load %arg9[%c32, %c0_32] : memref<48x256xf32, #tpu.memory_space<vmem>>, vector<8x256xf32>
    tpu.vector_store %arg9[%c32, %c0_32], %32 {strides = array<i32>} : memref<48x256xf32, #tpu.memory_space<vmem>>, vector<8x256xf32>,
    %59 = vector.shape_cast %53 : vector<1x256xf32> to vector<1x256xf32>
    %60 = vector.broadcast %59 : vector<1x256xf32> to vector<8x256xf32>
    %c40 = arith.constant 40 : index
    %c0_33 = arith.constant 0 : index
    %61 = vector.load %arg9[%c40, %c0_33] : memref<48x256xf32, #tpu.memory_space<vmem>>, vector<8x256xf32>
    tpu.vector_store %arg9[%c40, %c0_33], %60 {strides = array<i32>} : memref<48x256xf32, #tpu.memory_space<vmem>>, vector<8x256xf32>,
    return
  }
  func.func @transform_0(%arg0: i32) -> (i32, i32) {
    %c0_i32 = arith.constant 0 : i32
    %c0_i32_0 = arith.constant 0 : i32
    return %c0_i32, %arg0 : i32, i32
  }
  func.func @transform_1(%arg0: i32) -> (i32, i32) {
    %c0_i32 = arith.constant 0 : i32
    %c0_i32_0 = arith.constant 0 : i32
    return %c0_i32, %arg0 : i32, i32
  }
  func.func @transform_2(%arg0: i32) -> (i32, i32) {
    %c0_i32 = arith.constant 0 : i32
    %c0_i32_0 = arith.constant 0 : i32
    %c0_i32_1 = arith.constant 0 : i32
    return %c0_i32, %c0_i32_0 : i32, i32
  }
  func.func @transform_3(%arg0: i32) -> (i32, i32) {
    %c0_i32 = arith.constant 0 : i32
    %c0_i32_0 = arith.constant 0 : i32
    %c0_i32_1 = arith.constant 0 : i32
    return %c0_i32, %c0_i32_0 : i32, i32
  }
  func.func @transform_4(%arg0: i32) -> (i32, i32) {
    %c0_i32 = arith.constant 0 : i32
    %c0_i32_0 = arith.constant 0 : i32
    %c0_i32_1 = arith.constant 0 : i32
    return %c0_i32, %c0_i32_0 : i32, i32
  }
  func.func @transform_5(%arg0: i32) -> (i32, i32) {
    %c0_i32 = arith.constant 0 : i32
    %c0_i32_0 = arith.constant 0 : i32
    %c0_i32_1 = arith.constant 0 : i32
    return %c0_i32, %c0_i32_0 : i32, i32
  }
  func.func @transform_6(%arg0: i32) -> (i32, i32) {
    %c0_i32 = arith.constant 0 : i32
    %c0_i32_0 = arith.constant 0 : i32
    %c0_i32_1 = arith.constant 0 : i32
    return %c0_i32, %c0_i32_0 : i32, i32
  }
  func.func @transform_7(%arg0: i32) -> (i32, i32) {
    %c0_i32 = arith.constant 0 : i32
    %c0_i32_0 = arith.constant 0 : i32
    %c0_i32_1 = arith.constant 0 : i32
    return %c0_i32, %c0_i32_0 : i32, i32
  }
  func.func @transform_8(%arg0: i32) -> (i32, i32) {
    %c0_i32 = arith.constant 0 : i32
    %c0_i32_0 = arith.constant 0 : i32
    return %c0_i32, %arg0 : i32, i32
  }
}

</mosaic_0001>

<bundles_post_ra>
// kernel: tpu_custom_call.1
= control target key start
LH: loop header
LB: loop body
LE: loop exit
PB: predicated region body
PF: predicated region fallthrough
CT: control target
= control target key end

     0   :  { %13 = vsyncpa [#allocation4], 0  ;;  %s1196_s0 = inlined_call_operand.vmem [shape: f32[16,512], index: 0, kind: input, shape index: {}]   ;;  %s1197_s1 = inlined_call_operand.vmem [shape: f32[8,512], index: 1, kind: input, shape index: {}]   ;;  %s1198_s2 = inlined_call_operand.vmem [shape: bf16[32,16], index: 2, kind: input, shape index: {}]   ;;  %s1199_s3 = inlined_call_operand.vmem [shape: f32[32,1], index: 3, kind: input, shape index: {}]   ;;  %s1200_s4 = inlined_call_operand.vmem [shape: bf16[32,32], index: 4, kind: input, shape index: {}]   ;;  %s1201_s5 = inlined_call_operand.vmem [shape: f32[32,1], index: 5, kind: input, shape index: {}]   ;;  %s1202_s6 = inlined_call_operand.vmem [shape: bf16[16,32], index: 6, kind: input, shape index: {}]   ;;  %s1203_s7 = inlined_call_operand.vmem [shape: f32[16,1], index: 7, kind: input, shape index: {}]   ;;  %s1204_s8 = inlined_call_operand.hbm [shape: f32[48,512], index: 8, kind: output, shape index: {}]  }
   0x1   :  { %15 = vsyncpa [#allocation4 + $0x1], 0  ;;  %s1010_s27 = smov 0   ;;  %s1012_s28 = smov 0  }
   0x2   :  { %s1014_s29 = smov 0   ;;  %s1016_s30 = smov 0  }
   0x3 LB: > { %s1031_s9 = sadd.s32 4294967295, %s958_s30   ;;  %s805_s10 = sadd.s32 4294967294, %s958_s30   ;;  %s958_s30 = sphi %s1016_s30, %s1210_s30   ;;  %s954_s29 = sphi %s1014_s29, %s1209_s29   ;;  %s950_s28 = sphi %s1012_s28, %s1208_s28   ;;  %s946_s27 = sphi %s1010_s27, %s1207_s27  }
   0x4   : > { %s1035_s11 = sadd.s32 1, %s958_s30   ;;  %s28_s12 = sadd.s32 1, %s954_s29 }
   0x5   : > { %s25_s13 = ssub.s32 %s958_s30, %s1035_s11  ;;  %p35_p0 = scmp.ne.s32.totalorder %s954_s29, %s950_s28 }
   0x6   : > { %p26_p1 = scmp.eq.s32.totalorder %s25_s13, 0  ;;  %p36_p2 = scmp.eq.s32.totalorder %s958_s30, 0 }
   0x7   : > { %p217_p3 = scmp.eq.s32.totalorder %s1031_s9, 1  ;;  %p222_p4 = scmp.ne.s32.totalorder %s950_s28, %s946_s27 }
   0x8   : > { %s1047_s14 = scalar_select %p26_p1, %s954_s29, %s28_s12  }
   0x9   : > { %p37_p5 = por %p36_p2, %p35_p0  ;;  %p1049_p6 = por %p217_p3, %p35_p0 }
   0xa   : > { %p223_p7 = scmp.eq.s32.totalorder %s805_s10, 1  ;;  %p807_p9 = scmp.ge.s32.totalorder %s958_s30, 2 }
   0xc   : > { %p1053_p8 = por %p223_p7, %p222_p4  ;;  %257 = sbr.rel (%p807_p9) target bundleno = 26 (0x1a), region = 40 }
  0x13   : > { %260 = sbr.rel (!%p37_p5) target bundleno = 26 (0x1a), region = 44  ;;  %s262_s17 = sand.u32 (%p37_p5), 1, %s954_s29  }
  0x14   : > { %s831_s18 = sshll.u32 (%p37_p5), %s958_s30, 4  ;;  %s808_s19 = sshll.u32 (%p37_p5), %s262_s17, 5 }
  0x15   : > { %s267_s22 = scalar_lea.vmem (%p37_p5), %s1196_s0, %s831_s18  ;;  %s264_s23 = scalar_lea.vmem (%p37_p5), [#allocation2], %s808_s19 }
  0x16   : > { %v280_v0 = vld [vmem:[%s267_s22] sm:$0xff] (%p37_p5)  ;;  %v282_v1 = vld [vmem:[%s267_s22 + $0x8] sm:$0xff] (%p37_p5) }
  0x17   : > { %v284_v2 = vld [vmem:[%s267_s22 + $0x20] sm:$0xff] (%p37_p5)  ;;  %281 = vst [vmem:[%s264_s23] sm:$0xff] (%p37_p5), %v280_v0  ;;  %283 = vst [vmem:[%s264_s23 + $0x8] sm:$0xff] (%p37_p5), %v282_v1  ;;  %v286_v3 = vld [vmem:[%s267_s22 + $0x28] sm:$0xff] (%p37_p5) }
  0x18   : > { %285 = vst [vmem:[%s264_s23 + $0x10] sm:$0xff] (%p37_p5), %v284_v2  ;;  %287 = vst [vmem:[%s264_s23 + $0x18] sm:$0xff] (%p37_p5), %v286_v3 }
  0x1a PF: > { %p811_p10 = scmp.ge.s32.totalorder %s958_s30, 1  ;;  %p301_p11 = scmp.lt.s32.totalorder %s958_s30, 3 }
  0x1c   : > { %p302_p12 = pnand %p811_p10, %p301_p11 }
  0x1d   : > { %s1068_s24 = sand.u32 (!%p302_p12), 1, %s950_s28   ;;  %v960_v4 = vmov (!%p302_p12), 0   ;;  %v365_v5 = vld [vmem:[%s1199_s3] sm:$0xff] (!%p302_p12)  ;;  %v367_v11 = vld [vmem:[%s1199_s3 + $0x10] sm:$0xff] (!%p302_p12)  ;;  %v366_v12 = vld [vmem:[%s1199_s3 + $0x8] sm:$0xff] (!%p302_p12)  ;;  %vm399_vm0 = vcmask (!%p302_p12), 130048  }
  0x1e   : > { %305 = sbr.rel (%p302_p12) target bundleno = 804 (0x324), region = 71  ;;  %s812_s25 = sshll.u32 (!%p302_p12), %s1068_s24, 5  ;;  %438 = vmatprep.mubr.bf16.mxu0 (!%p302_p12), %v960_v4  ;;  %877 = vset.pattern.permute.xlu0 (!%p302_p12), %v960_v4  ;;  %v879_v14 = vld [vmem:[%s1198_s2] sm:$0xff] (!%p302_p12)   ;;  %v368_v15 = vld [vmem:[%s1199_s3 + $0x18] sm:$0xff] (!%p302_p12)  ;;  %v476_v17 = vld [vmem:[%s1201_s5 + $0x8] sm:$0xff] (!%p302_p12)  ;;  %vm509_vm1 = vcmask (!%p302_p12), 261120  }
  0x1f   : > { %878 = vset.pattern.permute.xlu1 (!%p302_p12), %v960_v4  ;;  %548 = vmatprep.mubr.bf16.mxu1 (!%p302_p12), %v960_v4  ;;  %s310_s12 = scalar_lea.vmem (!%p302_p12), [#allocation2], %s812_s25  ;;  %v475_v16 = vld [vmem:[%s1201_s5] sm:$0xff] (!%p302_p12)  ;;  %v477_v18 = vld [vmem:[%s1201_s5 + $0x10] sm:$0xff] (!%p302_p12)  ;;  %v880_v19 = vld [vmem:[%s1198_s2 + $0x8] sm:$0xff] (!%p302_p12)   ;;  %s833_s20 = smul.u32 (!%p302_p12), 96, %s1068_s24 }
  0x20   : > { %v356_v6 = vld [vmem:[%s310_s12 + $0x8] sm:$0xff] (!%p302_p12)  ;;  %v358_v7 = vld [vmem:[%s310_s12 + $0x18] sm:$0xff] (!%p302_p12)  ;;  %v355_v8 = vld [vmem:[%s310_s12] sm:$0xff] (!%p302_p12)  ;;  %371 = vperm.xlu0 (!%p302_p12), %877, %v365_v5   ;;  %381 = vperm.xlu1 (!%p302_p12), %878, %v367_v11   ;;  %s813_s22 = sshll.u32 (!%p302_p12), %s1031_s9, 1  ;;  %s832_s13 = sshll.u32 (!%p302_p12), %s1031_s9, 8 }
  0x21   : > { %v360_v9 = vpack.c.bf16 (!%p302_p12), %v358_v7, %v356_v6  ;;  %v357_v10 = vld [vmem:[%s310_s12 + $0x10] sm:$0xff] (!%p302_p12)  ;;  %v478_v20 = vld [vmem:[%s1201_s5 + $0x18] sm:$0xff] (!%p302_p12)  ;;  %v584_v21 = vld [vmem:[%s1203_s7 + $0x8] sm:$0xff] (!%p302_p12)  ;;  %s1127_s21 = scalar_lea.vmem (!%p302_p12), [#allocation3], %s833_s20  ;;  %p348_p13 = scmp.lt.s32.totalorder (!%p302_p12), %s813_s22, 3 }
  0x22   : > { %v359_v13 = vpack.c.bf16 (!%p302_p12), %v357_v10, %v355_v8  ;;  %v583_v22 = vld [vmem:[%s1203_s7] sm:$0xff] (!%p302_p12)  ;;  %v882_v56 = vld [vmem:[%s1200_s4 + $0x8] sm:$0xff] (!%p302_p12)   ;;  %s725_s12 = sshll.u32 (!%p302_p12), %s1127_s21, 4  ;;  %s1150_s19 = scalar_lea.hbm (!%p302_p12), %s1204_s8, %s832_s13  ;;  %s1145_s12 = int_to_ptr.vmem [resolvable:$true] %s725_s12 }
  0x23   : > { %406 = vmatprep.subr.bf16.mxu0 (!%p302_p12), %v360_v9  ;;  %v881_v55 = vld [vmem:[%s1200_s4] sm:$0xff] (!%p302_p12)   ;;  %s712_s20 = scalar_lea.sflag (!%p302_p12), [#allocation4], %s1068_s24  ;;  %s961_s9 = smov (!%p302_p12), [#allocation3]  }
  0x24   : > { %407 = vmatpush1.bf16.msra.mxu0 (!%p302_p12), %v359_v13  ;;  %376 = vperm.xlu0 (!%p302_p12), %877, %v366_v12  }
  0x25   : > { %386 = vperm.xlu1 %878, %v368_v15   ;;  %s1212_s22 = smov (!%p348_p13, %s813_s22), 3 }
  0x26   : > { %s814_s23 = sshll.u32 %s1212_s22, 3  ;;  %s896_s22 = scalar_lea.vmem %s1145_s12, 1536 }
  0x27   : > { %817 = vmatmul.mubr.msk.bf16.vlgmr.msra.gmra.mrb[0].mxu0 %vm399_vm0, %v879_v14  ;;  %s351_s10 = scalar_lea.vmem %s1197_s1, %s814_s23  ;;  %p897_p0 = scmp.ne.s32.totalorder %s1145_s12, %s896_s22 }
  0x28   : > { %448 = vmatprep.mubr.bf16.mxu0 %v960_v4  ;;  %481 = vperm.xlu0 %877, %v475_v16   ;;  %s900_s23 = sshll.u32 %s961_s9, 4  ;;  %s901_s23 = int_to_ptr.vmem [resolvable:$false] %s900_s23 }
  0x29   : > { %486 = vperm.xlu1 %878, %v476_v17   ;;  %p898_p1 = pnand %p897_p0, %p1049_p6  ;;  %s902_s25 = scalar_lea.vmem %s901_s23, 3072 }
  0x2a   : > { %p903_p3 = scmp.lt.s32.totalorder %s1145_s12, %s901_s23  ;;  %p904_p4 = scmp.lt.s32.totalorder %s902_s25, %s896_s22 }
  0x2b   : > { %p899_p2 = pneg %p898_p1 }
  0x2c   : > { %491 = vperm.xlu0 %877, %v477_v18   ;;  %p905_p5 = por %p904_p4, %p903_p3 }
  0x2d   : > { %496 = vperm.xlu1 %878, %v478_v20  }
  0x2e   : > { %p906_p7 = pnand %p905_p5, %p899_p2 }
  0x2f   : > { %818 = vmatmul.mubr.msk.bf16.gmra.mrb[4].mxu0 %vm399_vm0, %v880_v19 }
  0x30   : > { %592 = vperm.xlu0 %877, %v584_v21   ;;  %635 = vmatprep.mubr.bf16.mxu0 %v960_v4 }
  0x31   : > { %587 = vperm.xlu1 %878, %v583_v22  }
  0x9f   : > { %v372_v23 = vpop.permute.xlu0 %371  ;;  %v382_v32 = vpop.permute.xlu1 %381 }
  0xa3   : > { %v377_v27 = vpop.permute.xlu0 %376 }
  0xa4   : > { %v387_v43 = vpop.permute.xlu1 %386 }
  0xa7   : > { %v482_v57 = vpop.permute.xlu0 %481 }
  0xa8   : > { %v487_v61 = vpop.permute.xlu1 %486 }
  0xab   : > { %v492_v8 = vpop.permute.xlu0 %491 }
  0xac   : > { %v497_v13 = vpop.permute.xlu1 %496 }
  0xfa   : > { %v440_v24 = vpop.f32.mrb[0].mxu0 }
  0xfb   : > { %v441_v25 = vadd.f32 %v440_v24, %v372_v23  ;;  %v442_v26 = vpop.f32.mrb[1].mxu0 }
  0xfc   : > { %v443_v28 = vadd.f32 %v442_v26, %v372_v23  ;;  %v444_v29 = vpop.f32.mrb[2].mxu0  ;;  %v588_v26 = vpop.permute.xlu1 %587 }
  0xfd   : > { %v445_v30 = vadd.f32 %v444_v29, %v377_v27  ;;  %v446_v31 = vpop.f32.mrb[3].mxu0  ;;  %v459_v34 = vmax.f32 %v441_v25, 0.0  ;;  %v883_v25 = vld [vmem:[%s1202_s6] sm:$0xff]  }
  0xfe   : > { %v447_v33 = vadd.f32 %v446_v31, %v377_v27  ;;  %v460_v36 = vmax.f32 %v443_v28, 0.0 }
  0xff   : > { %v461_v35 = vmax.f32 %v445_v30, 0.0  ;;  %v593_v30 = vpop.permute.xlu0 %592 }
 0x100   : > { %v462_v37 = vmax.f32 %v447_v33, 0.0 }
 0x101   : > { %v471_v38 = vpack.c.bf16 %v461_v35, %v459_v34 }
 0x102   : > { %v450_v39 = vpop.f32.mrb[4].mxu0  ;;  %v472_v40 = vpack.c.bf16 %v462_v37, %v460_v36 }
 0x103   : > { %v451_v41 = vadd.f32 %v450_v39, %v382_v32  ;;  %v452_v42 = vpop.f32.mrb[5].mxu0 }
 0x104   : > { %v453_v44 = vadd.f32 %v452_v42, %v382_v32  ;;  %v454_v45 = vpop.f32.mrb[6].mxu0  ;;  %516 = vmatprep.subr.bf16.mxu1 %v472_v40 }
 0x105   : > { %v455_v46 = vadd.f32 %v454_v45, %v387_v43  ;;  %v456_v47 = vpop.f32.mrb[7].mxu0  ;;  %517 = vmatpush1.bf16.msra.mxu1 %v471_v38  ;;  %v463_v49 = vmax.f32 %v451_v41, 0.0 }
 0x106   : > { %v457_v48 = vadd.f32 %v456_v47, %v387_v43  ;;  %v464_v51 = vmax.f32 %v453_v44, 0.0  ;;  %v654_v43 = vld [vmem:[%s351_s10] sm:$0xff] }
 0x107   : > { %v465_v50 = vmax.f32 %v455_v46, 0.0  ;;  %v655_v46 = vld [vmem:[%s351_s10 + $0x8] sm:$0xff] }
 0x108   : > { %v466_v52 = vmax.f32 %v457_v48, 0.0 }
 0x109   : > { %v473_v53 = vpack.c.bf16 %v465_v50, %v463_v49 }
 0x10a   : > { %v474_v54 = vpack.c.bf16 %v466_v52, %v464_v51 }
 0x10c   : > { %518 = vmatprep.subr.bf16.mxu1 %v474_v54 }
 0x10d   : > { %519 = vmatpush1.bf16.msra.mxu1 %v473_v53 }
 0x110   : > { %821 = vmatmul.mubr.msk.bf16.vlgmr.msra.gmra.mrb[0].mxu1 %vm509_vm1, %v881_v55 }
 0x111   : > { %558 = vmatprep.mubr.bf16.mxu1 %v960_v4 }
 0x118   : > { %822 = vmatmul.mubr.msk.bf16.gmra.mrb[4].mxu1 %vm509_vm1, %v882_v56 }
 0x1e3   : > { %v550_v58 = vpop.f32.mrb[0].mxu1 }
 0x1e4   : > { %v551_v59 = vadd.f32 %v550_v58, %v482_v57  ;;  %v552_v60 = vpop.f32.mrb[1].mxu1 }
 0x1e5   : > { %v553_v62 = vadd.f32 %v552_v60, %v482_v57  ;;  %v554_v63 = vpop.f32.mrb[2].mxu1  ;;  %v662_v57 = vmul.f32 -0.5, %v654_v43 }
 0x1e6   : > { %v555_v0 = vadd.f32 %v554_v63, %v487_v61  ;;  %v556_v1 = vpop.f32.mrb[3].mxu1  ;;  %v569_v3 = vmax.f32 %v551_v59, 0.0  ;;  %v663_v59 = vmul.f32 -0.5, %v655_v46 }
 0x1e7   : > { %v557_v2 = vadd.f32 %v556_v1, %v487_v61  ;;  %v570_v6 = vmax.f32 %v553_v62, 0.0  ;;  %v664_v60 = vmul.f32 %v662_v57, %v654_v43  ;;  %v682_v61 = vlaneseq }
 0x1e8   : > { %v571_v5 = vmax.f32 %v555_v0, 0.0  ;;  %v665_v62 = vmul.f32 %v663_v59, %v655_v46 }
 0x1e9   : > { %v572_v4 = vmax.f32 %v557_v2, 0.0  ;;  %v683_v0 = vshrl.u32 %v682_v61, 7 }
 0x1ea   : > { %v579_v7 = vpack.c.bf16 %v571_v5, %v569_v3 }
 0x1eb   : > { %v580_v9 = vpack.c.bf16 %v572_v4, %v570_v6  ;;  %v560_v10 = vpop.f32.mrb[4].mxu1  ;;  %vm684_vm2 = vcmp.lt.s32.totalorder %v683_v0, 4 }
 0x1ec   : > { %v561_v11 = vadd.f32 %v560_v10, %v492_v8  ;;  %v562_v12 = vpop.f32.mrb[5].mxu1 }
 0x1ed   : > { %v563_v14 = vadd.f32 %v562_v12, %v492_v8  ;;  %v564_v15 = vpop.f32.mrb[6].mxu1  ;;  %603 = vmatprep.subr.bf16.mxu0 %v580_v9 }
 0x1ee   : > { %v565_v16 = vadd.f32 %v564_v15, %v497_v13  ;;  %v566_v17 = vpop.f32.mrb[7].mxu1  ;;  %604 = vmatpush1.bf16.msra.mxu0 %v579_v7  ;;  %v573_v19 = vmax.f32 %v561_v11, 0.0 }
 0x1ef   : > { %v567_v18 = vadd.f32 %v566_v17, %v497_v13  ;;  %v574_v21 = vmax.f32 %v563_v14, 0.0 }
 0x1f0   : > { %v575_v20 = vmax.f32 %v565_v16, 0.0 }
 0x1f1   : > { %v576_v22 = vmax.f32 %v567_v18, 0.0 }
 0x1f2   : > { %v581_v23 = vpack.c.bf16 %v575_v20, %v573_v19 }
 0x1f3   : > { %v582_v24 = vpack.c.bf16 %v576_v22, %v574_v21 }
 0x1f5   : > { %605 = vmatprep.subr.bf16.mxu0 %v582_v24 }
 0x1f6   : > { %606 = vmatpush1.bf16.msra.mxu0 %v581_v23 }
 0x1f9   : > { %824 = vmatmul.mubr.msk.bf16.vlgmr.msra.gmra.mrb[8].mxu0 %vm509_vm1, %v883_v25 }
 0x2cc   : > { %v637_v27 = vpop.f32.mrb[8].mxu0 }
 0x2cd   : > { %v638_v28 = vadd.f32 %v637_v27, %v588_v26  ;;  %v639_v29 = vpop.f32.mrb[9].mxu0 }
 0x2ce   : > { %v640_v31 = vadd.f32 %v639_v29, %v588_v26  ;;  %v641_v32 = vpop.f32.mrb[10].mxu0 }
 0x2cf   : > { %701 = vst [vmem:[%s1127_s21 + $0x10] sm:$0xff] %v638_v28  ;;  %v642_v33 = vadd.f32 %v641_v32, %v593_v30  ;;  %v643_v34 = vpop.f32.mrb[11].mxu0 }
 0x2d0   : > { %702 = vst [vmem:[%s1127_s21 + $0x18] sm:$0xff] %v640_v31  ;;  %v644_v35 = vadd.f32 %v643_v34, %v593_v30 }
 0x2d1   : > { %v646_v36 = vmax.f32 %v642_v33, -20.0 }
 0x2d2   : > { %v647_v37 = vmax.f32 %v644_v35, -20.0 }
 0x2d3   : > { %v648_v38 = vmin.f32 %v646_v36, 2.0 }
 0x2d4   : > { %v649_v39 = vmin.f32 %v647_v37, 2.0 }
 0x2d5   : > { %v650_v40 = vmul.f32 1.442695, %v648_v38  ;;  %703 = vst [vmem:[%s1127_s21 + $0x20] sm:$0xff] %v648_v38  ;;  %v666_v63 = vsub.f32 %v664_v60, %v648_v38 }
 0x2d6   : > { %v652_v41 = vmul.f32 1.442695, %v649_v39  ;;  %704 = vst [vmem:[%s1127_s21 + $0x28] sm:$0xff] %v649_v39  ;;  %v667_v1 = vsub.f32 %v665_v62, %v649_v39 }
 0x2d7   : > { %884 = vpow2.f32 %v650_v40  ;;  %v825_v5 = vadd.f32 -0.9189385, %v666_v63 }
 0x2d8   : > { %886 = vpow2.f32 %v652_v41  ;;  %v826_v4 = vadd.f32 -0.9189385, %v667_v1 }
 0x2e1   : > { %v885_v42 = vpop.eup %884 }
 0x2e2   : > { %v887_v44 = vpop.eup %886  ;;  %v656_v45 = vmul.f32 %v885_v42, %v654_v43  ;;  %705 = vst [vmem:[%s1127_s21 + $0x30] sm:$0xff] %v885_v42 }
 0x2e3   : > { %v657_v47 = vmul.f32 %v887_v44, %v655_v46  ;;  %706 = vst [vmem:[%s1127_s21 + $0x38] sm:$0xff] %v887_v44 }
 0x2e4   : > { %v658_v48 = vadd.f32 %v656_v45, %v638_v28 }
 0x2e5   : > { %v659_v49 = vadd.f32 %v657_v47, %v640_v31 }
 0x2e6   : > { %888 = vtanh.f32 %v658_v48  ;;  %707 = vst [vmem:[%s1127_s21 + $0x40] sm:$0xff] %v658_v48 }
 0x2e7   : > { %890 = vtanh.f32 %v659_v49  ;;  %708 = vst [vmem:[%s1127_s21 + $0x48] sm:$0xff] %v659_v49 }
 0x2f0   : > { %v889_v50 = vpop.eup %888 }
 0x2f1   : > { %v891_v51 = vpop.eup %890  ;;  %v670_v52 = vmul.f32 %v889_v50, %v889_v50  ;;  %699 = vst [vmem:[%s1127_s21] sm:$0xff] %v889_v50 }
 0x2f2   : > { %v671_v53 = vmul.f32 %v891_v51, %v891_v51  ;;  %700 = vst [vmem:[%s1127_s21 + $0x8] sm:$0xff] %v891_v51 }
 0x2f3   : > { %v672_v54 = vsub.f32 1.0, %v670_v52 }
 0x2f4   : > { %v673_v55 = vsub.f32 1.0, %v671_v53 }
 0x2f5   : > { %v674_v56 = vadd.f32 1e-06, %v672_v54 }
 0x2f6   : > { %v675_v58 = vadd.f32 1e-06, %v673_v55 }
 0x2f7   : > { %892 = vlog2.f32 %v674_v56 }
 0x2f8   : > { %894 = vlog2.f32 %v675_v58 }
 0x301   : > { %v893_v2 = vpop.eup %892 }
 0x302   : > { %v895_v3 = vpop.eup %894  ;;  %v677_v6 = vmul.f32 0.6931472, %v893_v2 }
 0x303   : > { %v679_v7 = vmul.f32 0.6931472, %v895_v3 }
 0x304   : > { %v680_v8 = vsub.f32 %v825_v5, %v677_v6 }
 0x305   : > { %v681_v9 = vsub.f32 %v826_v4, %v679_v7 }
 0x306   : > { %v685_v10 = vsel %vm684_vm2, %v680_v8, 0.0 }
 0x307   : > { %v687_v11 = vrot.slane %v685_v10, 4  ;;  %v686_v12 = vsel %vm684_vm2, %v681_v9, 0.0 }
 0x308   : > { %v693_v13 = vrot.slane %v686_v12, 4 }
 0x309   : > { %v688_v14 = vadd.f32 %v687_v11, %v685_v10 }
 0x30a   : > { %v694_v15 = vadd.f32 %v693_v13, %v686_v12 }
 0x30b   : > { %v689_v16 = vrot.slane %v688_v14, 2 }
 0x30c   : > { %v695_v17 = vrot.slane %v694_v15, 2 }
 0x30d   : > { %v690_v18 = vadd.f32 %v689_v16, %v688_v14 }
 0x30e   : > { %v696_v19 = vadd.f32 %v695_v17, %v694_v15 }
 0x30f   : > { %v691_v20 = vrot.slane %v690_v18, 1 }
 0x310   : > { %v697_v21 = vrot.slane %v696_v19, 1 }
 0x311   : > { %v692_v22 = vadd.f32 %v691_v20, %v690_v18 }
 0x312   : > { %v698_v23 = vadd.f32 %v697_v21, %v696_v19 }
 0x313   : > { %709 = vst [vmem:[%s1127_s21 + $0x50] sm:$0xff] %v692_v22 }
 0x314   : > { %710 = vst [vmem:[%s1127_s21 + $0x58] sm:$0xff] %v698_v23 }
 0x315   : > { %909 = shalt.err (!%p906_p7)
}
 0x316   : > { %s910_s21 = scalar_lea.hbm %s1150_s19, 1536  ;;  %s914_s13 = scalar_lea.hbm %s1204_s8, 3072 }
 0x317   : > { %p911_p10 = scmp.ne.s32.totalorder %s1150_s19, %s910_s21  ;;  %p915_p13 = scmp.lt.u32.totalorder %s1150_s19, %s1204_s8 }
 0x318   : > { %p916_p0 = scmp.lt.u32.totalorder %s914_s13, %s910_s21  ;;  %p918_p2 = scmp.lt.u32.totalorder %s910_s21, %s1150_s19 }
 0x319   : > { %p912_p11 = pnand %p911_p10, %p1049_p6 }
 0x31a   : > { %p917_p1 = por %p916_p0, %p915_p13 }
 0x31b   : > { %p913_p12 = pneg %p912_p11 }
 0x31c   : > { %p919_p3 = por %p918_p2, %p917_p1 }
 0x31e   : > { %p920_p4 = pnand %p919_p3, %p913_p12 }
 0x320   : > { %923 = shalt.err (!%p920_p4)
}
 0x321   : > { %s962_s22 = smov 256   ;;  %s963_s9 = smov 512  }
 0x322   : > { %s964_s23 = smov 16  }
 0x323   : > { %834 = dma.vmem_to_hbm [thread:$0]  (%p1049_p6), %s1145_s12, 1536, %s1150_s19, %s712_s20, %s962_s22, %s963_s9, %s964_s23  }
 0x324 PF: > { %s740_s25 = sand.u32 1, %s946_s27   ;;  %p837_p5 = pnand %p807_p9, %p1053_p8 }
 0x325   : > { %s741_s21 = scalar_lea.sflag [#allocation4], %s740_s25 }
 0x326   : > { %941 = dma.done.wait (!%p837_p5), %s741_s21, 1536  }
 0x327   : > { %943 = vsyncadd (!%p837_p5), %s741_s21, 4294965760  ;;  %p18_p7 = scmp.ge.s32.totalorder %s1035_s11, 4   ;;  %s1207_s27 = smov %s950_s28 }
 0x328   : > { %s1208_s28 = smov %s954_s29  ;;  %s1209_s29 = smov %s1047_s14 }
 0x329   : > { %s1210_s30 = smov %s1035_s11  ;;  %20 = sbr.rel (!%p18_p7) target bundleno = 3 (0x3), region = 118 }
 0x330   :  { %746 = vsyncpa [#allocation4], 1 }
 0x331   :  { %748 = vsyncpa [#allocation4 + $0x1], 1 }

</bundles_post_ra>
